<compile_context>
chip_gen: v6e
topology: v6e:2x2x1
jax: 0.10.0
libtpu: 0.0.40
codegen_flags: <defaults>
</compile_context>

<pallas_src>
import functools
import math

import jax
import jax.numpy as jnp
from jax import lax
from jax.experimental import pallas as pl
from jax.experimental.pallas import tpu as pltpu

_LN_EPS = 1e-5
_MXU_DTYPE = jnp.bfloat16     # matmul-operand dtype (f32 accumulation on the MXU)


def _round_up(x, m):
    return ((x + m - 1) // m) * m


def _compiler_params(est_bytes, semantics):
    # Explicit VMEM budget: v5e's default scoped limit (~16 MiB) is too small for
    # 512-row f32 tiles with large Din; v7x physical VMEM is only 64 MiB, so cap
    # well below it and leave headroom for double-buffering.
    lim = int(min(56 * 2**20, max(32 * 2**20, 2 * est_bytes)))
    return pltpu.CompilerParams(dimension_semantics=semantics,
                                vmem_limit_bytes=lim)


# ----------------------------------------------------------------------------
# Pallas kernels
# ----------------------------------------------------------------------------

def _ln_linear(x, g, be, w, b, relu):
    """LayerNorm -> Linear -> optional ReLU on a (rows, D) tile (traced in-kernel).

    Elementwise math in f32 (v5e VPU has no bf16); MXU operands cast to the
    weight dtype (bf16) with f32 accumulation."""
    mean = jnp.mean(x, axis=-1, keepdims=True)
    var = jnp.mean((x - mean) ** 2, axis=-1, keepdims=True)     # biased, like torch
    xn = (x - mean) * lax.rsqrt(var + _LN_EPS) * g + be
    y = jnp.dot(xn.astype(w.dtype), w, preferred_element_type=jnp.float32) + b
    if relu:
        y = jnp.maximum(y, 0.0)
    return y


def _proj1_kernel(x_ref, g_ref, be_ref, w_ref, b_ref, o_ref, *, relu):
    """Single LinearLayer on a row tile (fallback for odd stack depths)."""
    o_ref[...] = _ln_linear(x_ref[...], g_ref[...], be_ref[...],
                            w_ref[...], b_ref[...], relu)


def _proj2_kernel(x_ref, g1_ref, be1_ref, w1_ref, b1_ref,
                  g2_ref, be2_ref, w2_ref, b2_ref, o_ref, *, relu1, relu2):
    """Two fused LinearLayers (LN->Lin->ReLU? -> LN->Lin->ReLU?) on a row tile."""
    h = _ln_linear(x_ref[...], g1_ref[...], be1_ref[...],
                   w1_ref[...], b1_ref[...], relu1)
    o_ref[...] = _ln_linear(h, g2_ref[...], be2_ref[...],
                            w2_ref[...], b2_ref[...], relu2)


def _heads_mix_kernel(x_ref, wc_ref, bc_ref, w1_ref, b1_ref, w2_ref, b2_ref,
                      w3_ref, b3_ref, xmix_ref, omix_ref, oconf_ref, *, K, L):
    """Both ConfidenceScorers (conv(1,K)+ReLU -> MLP C->C/2->C/2->1) + the mix.

    x_ref : (Rb, C)       flattened rows, whole batches per block (Rb = bt*L)
    wc_ref: (K, C, 2C)    bf16, both heads' conv taps stacked on the output axis
    w1_ref: (2C, 2Ch)     bf16, block-diag(w1_class, w1_conf)
    w2_ref: (2Ch, 2Ch)    bf16, block-diag(w2_class, w2_conf)
    w3_ref: (1, 2Ch)      f32, concat(w3_class, w3_conf);  b3_ref: (2,) SMEM
    outputs: (1, 1, Rb)   lane-dense score rows.
    """
    xf = x_ref[...]                                   # (Rb, C) f32
    Rb, C = xf.shape
    pad = K // 2
    # Temporal index of each row (rows are batch-major, Rb = bt*L): in-kernel
    # iota — no 1-lane-wide int32 input stream.
    lidx = lax.broadcasted_iota(jnp.int32, (Rb, 1), 0) % L

    # Temporal conv for BOTH heads: K per-tap (Rb,C)@(C,2C) dots accumulated in
    # f32.  No materialized (Rb, K*C) im2col slab; conv zero-padding and batch
    # isolation are a roll + mask (blocks hold whole batches).
    conv = jnp.zeros((Rb, 2 * C), jnp.float32)
    for t in range(K):
        s = t - pad
        if s == 0:
            tap = xf
        else:
            rolled = pltpu.roll(xf, shift=(-s) % Rb, axis=0)
            valid = jnp.logical_and(lidx + s >= 0, lidx + s < L)
            tap = jnp.where(valid, rolled, 0.0)
        conv += jnp.dot(tap.astype(_MXU_DTYPE), wc_ref[t],
                        preferred_element_type=jnp.float32)
    conv = jnp.maximum(conv + bc_ref[...], 0.0)       # (Rb, 2C)

    # Both heads' MLP stages in one MXU call per stage (block-diagonal weights:
    # halves matmul setup/drain count; the zero blocks add ~1.5*Rb*C^2 MACs,
    # small next to the 2K*Rb*C^2 conv).
    h1 = jnp.maximum(
        jnp.dot(conv.astype(_MXU_DTYPE), w1_ref[...],
                preferred_element_type=jnp.float32) + b1_ref[...], 0.0)   # (Rb, 2Ch)
    h2 = jnp.maximum(
        jnp.dot(h1.astype(_MXU_DTYPE), w2_ref[...],
                preferred_element_type=jnp.float32) + b2_ref[...], 0.0)   # (Rb, 2Ch)

    # Final (C/2 -> 1) projections: VPU multiply + lane reductions, not MXU N=1.
    prod = h2 * w3_ref[...]                           # (Rb, 2Ch) f32
    ch2 = prod.shape[-1]
    lane = lax.broadcasted_iota(jnp.int32, (Rb, ch2), 1)
    cls_sum = jnp.sum(jnp.where(lane < ch2 // 2, prod, 0.0), axis=-1)
    tot_sum = jnp.sum(prod, axis=-1)
    cls = cls_sum + b3_ref[0]
    conf = (tot_sum - cls_sum) + b3_ref[1]

    xm = xmix_ref[0]
    omix_ref[0, 0, :] = xm * cls + (1.0 - xm) * conf
    oconf_ref[0, 0, :] = conf


# ----------------------------------------------------------------------------
# Wrappers
# ----------------------------------------------------------------------------

def _row_block(n_rows, target=512):
    # target=512 keeps an f32 input tile + bf16 weights comfortably inside v7x's
    # 64 MiB VMEM; v5e/v6e (128 MiB) could take 1024 — the explicit
    # vmem_limit_bytes below already permits it.
    rb = _round_up(min(target, n_rows), 8)
    # Prefer >= 2 grid steps so the 'parallel' axis can shard across v7x's 2 TCs.
    if n_rows > 8 and _round_up(n_rows, rb) // rb < 2:
        rb = max(8, _round_up(max(rb // 2, 8), 8))
    return rb


def _choose_bt(B, L, target_rows=1024):
    """Whole batches per block (so the temporal conv never crosses a block).
    Prefer (a) >= 2 grid steps when B >= 2 (v7x has 2 TensorCores),
    (b) Rb = bt*L a multiple of 128 (unmasked lane-dense stores),
    (c) Rb near target_rows (amortize per-step pipeline overhead)."""
    best = None
    for bt in range(1, B + 1):
        Rb = bt * L
        if Rb % 8 != 0:
            continue
        G = -(-B // bt)
        key = (1 if (G >= 2 or B == 1) else 0,
               1 if Rb % 128 == 0 else 0,
               -abs(Rb - target_rows))
        if best is None or key > best[0]:
            best = (key, bt)
    if best is not None:
        return best[1]
    return 8 // math.gcd(8, L)     # smallest bt making (bt*L) % 8 == 0


def _proj1_call(x2d, layer, rb):
    R, Din = x2d.shape
    Dout = layer["w"].shape[1]
    est = (2 * rb * Din * 4 + 2 * rb * Dout * 4
           + 2 * Din * Dout * 2 + 4 * (Din + Dout) * 4)
    return pl.pallas_call(
        functools.partial(_proj1_kernel, relu=layer["relu"]),
        out_shape=jax.ShapeDtypeStruct((R, Dout), jnp.float32),
        grid=(R // rb,),
        in_specs=[
            pl.BlockSpec((rb, Din), lambda i: (i, 0)),
            pl.BlockSpec((1, Din), lambda i: (0, 0)),
            pl.BlockSpec((1, Din), lambda i: (0, 0)),
            pl.BlockSpec((Din, Dout), lambda i: (0, 0)),
            pl.BlockSpec((1, Dout), lambda i: (0, 0)),
        ],
        out_specs=pl.BlockSpec((rb, Dout), lambda i: (i, 0)),
        compiler_params=_compiler_params(est, ("parallel",)),
    )(x2d, layer["ln_g"].reshape(1, Din), layer["ln_b"].reshape(1, Din),
      layer["w"].astype(_MXU_DTYPE), layer["b"].reshape(1, Dout))


def _proj2_call(x2d, l1, l2, rb):
    R, Din = x2d.shape
    Dmid = l1["w"].shape[1]
    Dout = l2["w"].shape[1]
    est = (2 * rb * Din * 4 + 2 * rb * Dout * 4 + rb * Dmid * 4
           + 2 * (Din * Dmid + Dmid * Dout) * 2
           + 4 * (Din + 2 * Dmid + Dout) * 4)
    return pl.pallas_call(
        functools.partial(_proj2_kernel, relu1=l1["relu"], relu2=l2["relu"]),
        out_shape=jax.ShapeDtypeStruct((R, Dout), jnp.float32),
        grid=(R // rb,),
        in_specs=[
            pl.BlockSpec((rb, Din), lambda i: (i, 0)),
            pl.BlockSpec((1, Din), lambda i: (0, 0)),
            pl.BlockSpec((1, Din), lambda i: (0, 0)),
            pl.BlockSpec((Din, Dmid), lambda i: (0, 0)),
            pl.BlockSpec((1, Dmid), lambda i: (0, 0)),
            pl.BlockSpec((1, Dmid), lambda i: (0, 0)),
            pl.BlockSpec((1, Dmid), lambda i: (0, 0)),
            pl.BlockSpec((Dmid, Dout), lambda i: (0, 0)),
            pl.BlockSpec((1, Dout), lambda i: (0, 0)),
        ],
        out_specs=pl.BlockSpec((rb, Dout), lambda i: (i, 0)),
        compiler_params=_compiler_params(est, ("parallel",)),
    )(x2d, l1["ln_g"].reshape(1, Din), l1["ln_b"].reshape(1, Din),
      l1["w"].astype(_MXU_DTYPE), l1["b"].reshape(1, Dmid),
      l2["ln_g"].reshape(1, Dmid), l2["ln_b"].reshape(1, Dmid),
      l2["w"].astype(_MXU_DTYPE), l2["b"].reshape(1, Dout))


def proj_stack(x, layers):
    """Stack of LinearLayer (layer_norm=True, eval-mode dropout = identity),
    row-tiled over the flattened (B*L) axis, pairwise fused."""
    B, L, Din = x.shape
    R = B * L
    rb = _row_block(R)
    Rp = _round_up(R, rb)
    x2d = x.reshape(R, Din)
    if Rp != R:
        x2d = jnp.pad(x2d, ((0, Rp - R), (0, 0)))
    i = 0
    while i < len(layers):
        if i + 1 < len(layers):
            x2d = _proj2_call(x2d, layers[i], layers[i + 1], rb)
            i += 2
        else:
            x2d = _proj1_call(x2d, layers[i], rb)
            i += 1
    return x2d[:R].reshape(B, L, x2d.shape[-1])


def heads_and_mix(x, class_p, conf_p, x_mix, K):
    """Fused class_head + conf_head + (x*class + (1-x)*conf) on a shared input.
    Returns (out_class_mixed, out_conf), each (B, L, 1)."""
    B, L, C = x.shape
    Ch = class_p["w1"].shape[1]

    bt = _choose_bt(B, L)
    Bp = _round_up(B, bt)
    if Bp != B:
        x = jnp.pad(x, ((0, Bp - B), (0, 0), (0, 0)))
    G = Bp // bt
    Rb = bt * L
    xf = x.reshape(Bp * L, C)

    # Both heads' conv taps stacked on the output axis: (K, C, 2C).
    # NOTE: PyTorch Conv2d stores weight as (out, in, 1, K) and computes
    # cross-correlation; loading real checkpoints needs permute to (K, in, out)
    # with no tap flip.  Here wconv is already (K, in, out).
    wc = jnp.concatenate([class_p["wconv"], conf_p["wconv"]],
                         axis=-1).astype(_MXU_DTYPE)                     # (K, C, 2C)
    bc = jnp.concatenate([class_p["bconv"], conf_p["bconv"]]).reshape(1, 2 * C)
    zc = jnp.zeros((C, Ch), jnp.float32)
    zh = jnp.zeros((Ch, Ch), jnp.float32)
    w1 = jnp.concatenate([jnp.concatenate([class_p["w1"], zc], 1),
                          jnp.concatenate([zc, conf_p["w1"]], 1)],
                         0).astype(_MXU_DTYPE)                           # (2C, 2Ch)
    b1 = jnp.concatenate([class_p["b1"], conf_p["b1"]]).reshape(1, 2 * Ch)
    w2 = jnp.concatenate([jnp.concatenate([class_p["w2"], zh], 1),
                          jnp.concatenate([zh, conf_p["w2"]], 1)],
                         0).astype(_MXU_DTYPE)                           # (2Ch, 2Ch)
    b2 = jnp.concatenate([class_p["b2"], conf_p["b2"]]).reshape(1, 2 * Ch)
    w3 = jnp.concatenate([class_p["w3"].reshape(-1),
                          conf_p["w3"].reshape(-1)]).reshape(1, 2 * Ch)  # f32
    b3 = jnp.stack([class_p["b3"].reshape(()), conf_p["b3"].reshape(())], axis=0)

    def full(shape):
        return pl.BlockSpec(shape, lambda i, _n=len(shape): (0,) * _n)

    smem = pl.BlockSpec(memory_space=pltpu.MemorySpace.SMEM)

    est = (2 * Rb * C * 4                          # x blocks (double-buffered)
           + 2 * 2 * Rb * 4 * 2                    # two (1,1,Rb) outputs, 2 buffers
           + Rb * (2 * C + 4 * Ch) * 4             # conv / h1 / h2 intermediates
           + 2 * (K * C * 2 * C + 2 * C * 2 * Ch + 4 * Ch * Ch) * 2)

    out_mix, out_conf = pl.pallas_call(
        functools.partial(_heads_mix_kernel, K=K, L=L),
        out_shape=(jax.ShapeDtypeStruct((G, 1, Rb), jnp.float32),
                   jax.ShapeDtypeStruct((G, 1, Rb), jnp.float32)),
        grid=(G,),
        in_specs=[
            pl.BlockSpec((Rb, C), lambda i: (i, 0)),
            full((K, C, 2 * C)),
            full((1, 2 * C)),
            full((2 * C, 2 * Ch)),
            full((1, 2 * Ch)),
            full((2 * Ch, 2 * Ch)),
            full((1, 2 * Ch)),
            full((1, 2 * Ch)),
            smem,      # b3 (2,)
            smem,      # mix scalar (1,)
        ],
        out_specs=(pl.BlockSpec((1, 1, Rb), lambda i: (i, 0, 0)),
                   pl.BlockSpec((1, 1, Rb), lambda i: (i, 0, 0))),
        compiler_params=_compiler_params(est, ("parallel",)),
    )(xf, wc, bc, w1, b1, w2, b2, w3, b3, x_mix)

    out_mix = out_mix.reshape(Bp, L)[:B].reshape(B, L, 1)
    out_conf = out_conf.reshape(Bp, L)[:B].reshape(B, L, 1)
    return out_mix, out_conf


# ----------------------------------------------------------------------------
# Parameter init (deterministic, mirrors the module's __init__ shapes)
# ----------------------------------------------------------------------------

def _linear_init(key, din, dout, std=0.02):
    return (jax.random.normal(key, (din, dout), jnp.float32) * std,
            jnp.zeros((dout,), jnp.float32))


def init_params(key, *, txt_dim, vid_dim, hidden, num_dummies, K, n_input_proj=2):
    ks = iter(jax.random.split(key, 64))
    relu_args = [True, True, True]
    relu_args[n_input_proj - 1] = False

    def proj_params(din):
        layers = []
        d = din
        for i in range(n_input_proj):
            w, b = _linear_init(next(ks), d, hidden)
            layers.append(dict(ln_g=jnp.ones((d,), jnp.float32),
                               ln_b=jnp.zeros((d,), jnp.float32),
                               w=w, b=b, relu=relu_args[i]))
            d = hidden
        return layers

    def scorer_params():
        wconv = jax.random.normal(next(ks), (K, hidden, hidden), jnp.float32) * 0.02
        w1, b1 = _linear_init(next(ks), hidden, hidden // 2)
        w2, b2 = _linear_init(next(ks), hidden // 2, hidden // 2)
        w3, b3 = _linear_init(next(ks), hidden // 2, 1)
        return dict(wconv=wconv, bconv=jnp.zeros((hidden,), jnp.float32),
                    w1=w1, b1=b1, w2=w2, b2=b2, w3=w3, b3=b3)

    return dict(
        input_vid_proj=proj_params(vid_dim),
        input_txt_proj=proj_params(txt_dim),
        token_type_emb=jax.random.normal(next(ks), (2, hidden), jnp.float32) * 0.02,
        dummy_rep_token=jax.random.normal(next(ks), (num_dummies, hidden), jnp.float32),
        class_head=scorer_params(),
        conf_head=scorer_params(),
        x=jnp.array([0.5], jnp.float32),
    )


# ----------------------------------------------------------------------------
# FlashVTG forward (eval mode)
# ----------------------------------------------------------------------------

def flash_vtg_forward(params, src_txt, src_txt_mask, src_vid, src_vid_mask, cfg):
    v = proj_stack(src_vid, params["input_vid_proj"])
    t = proj_stack(src_txt, params["input_txt_proj"])

    # token type embeddings (index 1 for video, 0 for text)
    v = v + params["token_type_emb"][1][None, None, :]
    t = t + params["token_type_emb"][0][None, None, :]

    B = v.shape[0]
    nd, H = cfg["num_dummies"], cfg["hidden"]
    txt_dummy = jnp.broadcast_to(params["dummy_rep_token"][None], (B, nd, H))
    src_txt_dummy = jnp.concatenate([txt_dummy, t], axis=1)
    # TODO(synk): txtproj_encoder (TransformerEncoder/TransformerEncoderLayer) is not defined in the reference; pass-through.
    dummy_token = src_txt_dummy[:, :nd]
    src_txt_dummy = jnp.concatenate([dummy_token, t], axis=1)
    src = jnp.concatenate([v, src_txt_dummy], axis=1)

    # TODO(synk): self.transformer / position_embed / PositionEmbeddingSine / saliency_proj are external modules not provided; use projected video tokens as video_emb.
    video_emb = v
    # TODO(synk): pyramid / pooling / coord_head (build_adapter) and PointGenerator are not provided; single-level
    # pyramid means class_head and conf_head share the same input, so both heads + the mix fuse into one kernel.
    out_class, out_conf = heads_and_mix(video_emb, params["class_head"],
                                        params["conf_head"], params["x"], cfg["K"])

    return dict(
        _avg_factor=B,
        saliency_scores=None,          # TODO(synk): produced by the external transformer
        t2vattnvalues=None,            # TODO(synk): needs transformer attn_weights
        out_class=out_class,
        out_conf=out_conf,
        video_emb=video_emb,
        fused_src=src,
        dummy_tokens=dummy_token,
        saliency_scores_neg=None,
        t2vattnvalues_neg=None,
        real_neg_mask=None,
    )


# ----------------------------------------------------------------------------
# Pure-JAX reference (for verification of the Pallas paths)
# ----------------------------------------------------------------------------

def _ref_linear_layer(x, g, be, w, b, relu, eps=_LN_EPS):
    mean = x.mean(-1, keepdims=True)
    var = ((x - mean) ** 2).mean(-1, keepdims=True)
    xn = (x - mean) / jnp.sqrt(var + eps) * g + be
    y = xn @ w + b
    return jnp.maximum(y, 0.0) if relu else y


def _ref_conf_scorer(x, p, K):
    pad = K // 2
    L = x.shape[1]
    xp = jnp.pad(x, ((0, 0), (pad, pad), (0, 0)))
    acc = sum(jnp.einsum("blc,cd->bld", xp[:, t:t + L], p["wconv"][t]) for t in range(K))
    acc = jnp.maximum(acc + p["bconv"], 0.0)
    h = jnp.maximum(acc @ p["w1"] + p["b1"], 0.0)
    h = jnp.maximum(h @ p["w2"] + p["b2"], 0.0)
    return h @ p["w3"] + p["b3"]


# ----------------------------------------------------------------------------

if __name__ == "__main__":
    B, L_vid, L_txt = 2, 16, 8
    vid_dim, txt_dim, hidden = 24, 20, 32
    num_dummies, K = 3, 3
    cfg = dict(num_dummies=num_dummies, hidden=hidden, K=K)

    key = jax.random.PRNGKey(0)
    k1, k2, k3 = jax.random.split(key, 3)
    params = init_params(k1, txt_dim=txt_dim, vid_dim=vid_dim, hidden=hidden,
                         num_dummies=num_dummies, K=K, n_input_proj=2)

    src_vid = jax.random.normal(k2, (B, L_vid, vid_dim), jnp.float32)
    src_txt = jax.random.normal(k3, (B, L_txt, txt_dim), jnp.float32)
    src_vid_mask = jnp.ones((B, L_vid), jnp.float32)
    src_txt_mask = jnp.ones((B, L_txt), jnp.float32)

    out = flash_vtg_forward(params, src_txt, src_txt_mask, src_vid, src_vid_mask, cfg)
    jax.block_until_ready(out["out_class"])
    jax.block_until_ready(out["out_conf"])
    jax.block_until_ready(out["video_emb"])

    # pure-JAX f32 reference over the implemented paths (kernels use bf16 MXU
    # operands -> compare with looser tolerances)
    ref_v = src_vid
    for p in params["input_vid_proj"]:
        ref_v = _ref_linear_layer(ref_v, p["ln_g"], p["ln_b"], p["w"], p["b"], p["relu"])
    ref_v = ref_v + params["token_type_emb"][1]
    ref_t = src_txt
    for p in params["input_txt_proj"]:
        ref_t = _ref_linear_layer(ref_t, p["ln_g"], p["ln_b"], p["w"], p["b"], p["relu"])
    ref_t = ref_t + params["token_type_emb"][0]
    ref_cls = _ref_conf_scorer(ref_v, params["class_head"], K)
    ref_conf = _ref_conf_scorer(ref_v, params["conf_head"], K)
    xv = params["x"][0]
    ref_mix = xv * ref_cls + (1.0 - xv) * ref_conf

    TOL = dict(atol=2e-2, rtol=2e-2)
    assert out["out_class"].shape == (B, L_vid, 1)
    assert jnp.allclose(out["video_emb"], ref_v, **TOL), "vid proj mismatch"
    assert jnp.allclose(out["fused_src"][:, L_vid + num_dummies:], ref_t, **TOL), \
        "txt proj mismatch"
    assert jnp.allclose(out["out_conf"], ref_conf, **TOL), "conf head mismatch"
    assert jnp.allclose(out["out_class"], ref_mix, **TOL), "out_class mismatch"

    print("KERNEL_OK")
</pallas_src>

<mosaic_0001>
module attributes {stable_mosaic.version = 11 : i64} {
  func.func @_proj2_kernel(%arg0: i32, %arg1: memref<16x24xf32, #tpu.memory_space<vmem>>, %arg2: memref<1x24xf32, #tpu.memory_space<vmem>>, %arg3: memref<1x24xf32, #tpu.memory_space<vmem>>, %arg4: memref<24x32xbf16, #tpu.memory_space<vmem>>, %arg5: memref<1x32xf32, #tpu.memory_space<vmem>>, %arg6: memref<1x32xf32, #tpu.memory_space<vmem>>, %arg7: memref<1x32xf32, #tpu.memory_space<vmem>>, %arg8: memref<32x32xbf16, #tpu.memory_space<vmem>>, %arg9: memref<1x32xf32, #tpu.memory_space<vmem>>, %arg10: memref<16x32xf32, #tpu.memory_space<vmem>>) attributes {dimension_semantics = [#tpu.dimension_semantics<parallel>], iteration_bounds = array<i64: 2>, scalar_prefetch = 0 : i64, scratch_operands = 0 : i64, tpu.core_type = #tpu.core_type<tc>, window_params = [{transform_indices = @transform_0, window_bounds = array<i64: 16, 24>}, {pipeline_mode = #tpu.pipeline_mode<synchronous>, transform_indices = @transform_1, window_bounds = array<i64: 1, 24>}, {pipeline_mode = #tpu.pipeline_mode<synchronous>, transform_indices = @transform_2, window_bounds = array<i64: 1, 24>}, {pipeline_mode = #tpu.pipeline_mode<synchronous>, transform_indices = @transform_3, window_bounds = array<i64: 24, 32>}, {pipeline_mode = #tpu.pipeline_mode<synchronous>, transform_indices = @transform_4, window_bounds = array<i64: 1, 32>}, {pipeline_mode = #tpu.pipeline_mode<synchronous>, transform_indices = @transform_5, window_bounds = array<i64: 1, 32>}, {pipeline_mode = #tpu.pipeline_mode<synchronous>, transform_indices = @transform_6, window_bounds = array<i64: 1, 32>}, {pipeline_mode = #tpu.pipeline_mode<synchronous>, transform_indices = @transform_7, window_bounds = array<i64: 32, 32>}, {pipeline_mode = #tpu.pipeline_mode<synchronous>, transform_indices = @transform_8, window_bounds = array<i64: 1, 32>}, {transform_indices = @transform_9, window_bounds = array<i64: 16, 32>}]} {
    %c0 = arith.constant 0 : index
    %c0_0 = arith.constant 0 : index
    %0 = vector.load %arg1[%c0, %c0_0] : memref<16x24xf32, #tpu.memory_space<vmem>>, vector<16x24xf32>
    %c0_1 = arith.constant 0 : index
    %c0_2 = arith.constant 0 : index
    %1 = vector.load %arg2[%c0_1, %c0_2] : memref<1x24xf32, #tpu.memory_space<vmem>>, vector<1x24xf32>
    %c0_3 = arith.constant 0 : index
    %c0_4 = arith.constant 0 : index
    %2 = vector.load %arg3[%c0_3, %c0_4] : memref<1x24xf32, #tpu.memory_space<vmem>>, vector<1x24xf32>
    %c0_5 = arith.constant 0 : index
    %c0_6 = arith.constant 0 : index
    %3 = vector.load %arg4[%c0_5, %c0_6] : memref<24x32xbf16, #tpu.memory_space<vmem>>, vector<24x32xbf16>
    %c0_7 = arith.constant 0 : index
    %c0_8 = arith.constant 0 : index
    %4 = vector.load %arg5[%c0_7, %c0_8] : memref<1x32xf32, #tpu.memory_space<vmem>>, vector<1x32xf32>
    %cst = arith.constant dense<0.000000e+00> : vector<16xf32>
    %5 = vector.multi_reduction <add>, %0, %cst [1] : vector<16x24xf32> to vector<16xf32>
    %6 = vector.shape_cast %5 : vector<16xf32> to vector<16x1xf32>
    %cst_9 = arith.constant 2.400000e+01 : f32
    %7 = vector.broadcast %cst_9 : f32 to vector<16x1xf32>
    %8 = arith.divf %6, %7 : vector<16x1xf32>
    %9 = vector.broadcast %8 : vector<16x1xf32> to vector<16x24xf32>
    %10 = arith.subf %0, %9 : vector<16x24xf32>
    %11 = arith.mulf %10, %10 : vector<16x24xf32>
    %cst_10 = arith.constant dense<0.000000e+00> : vector<16xf32>
    %12 = vector.multi_reduction <add>, %11, %cst_10 [1] : vector<16x24xf32> to vector<16xf32>
    %13 = vector.shape_cast %12 : vector<16xf32> to vector<16x1xf32>
    %cst_11 = arith.constant 2.400000e+01 : f32
    %14 = vector.broadcast %cst_11 : f32 to vector<16x1xf32>
    %15 = arith.divf %13, %14 : vector<16x1xf32>
    %16 = vector.broadcast %8 : vector<16x1xf32> to vector<16x24xf32>
    %17 = arith.subf %0, %16 : vector<16x24xf32>
    %cst_12 = arith.constant 9.99999974E-6 : f32
    %18 = vector.broadcast %cst_12 : f32 to vector<16x1xf32>
    %19 = arith.addf %15, %18 : vector<16x1xf32>
    %20 = math.rsqrt %19 : vector<16x1xf32>
    %21 = vector.broadcast %20 : vector<16x1xf32> to vector<16x24xf32>
    %22 = arith.mulf %17, %21 : vector<16x24xf32>
    %23 = vector.broadcast %1 : vector<1x24xf32> to vector<16x24xf32>
    %24 = arith.mulf %22, %23 : vector<16x24xf32>
    %25 = vector.broadcast %2 : vector<1x24xf32> to vector<16x24xf32>
    %26 = arith.addf %24, %25 : vector<16x24xf32>
    %27 = arith.truncf %26 : vector<16x24xf32> to vector<16x24xbf16>
    %cst_13 = arith.constant dense<0.000000e+00> : vector<16x32xf32>
    %28 = tpu.matmul %27, %3, %cst_13 {dimension_numbers = #tpu.dot_dimension_numbers<[1], [0], [0], [1], [0, 0, 1, 1], [], []>} : vector<16x24xbf16>, vector<24x32xbf16>, vector<16x32xf32> -> vector<16x32xf32>
    %29 = vector.broadcast %4 : vector<1x32xf32> to vector<16x32xf32>
    %30 = arith.addf %28, %29 : vector<16x32xf32>
    %cst_14 = arith.constant 0.000000e+00 : f32
    %31 = vector.broadcast %cst_14 : f32 to vector<16x32xf32>
    %32 = arith.maximumf %30, %31 : vector<16x32xf32>
    %c0_15 = arith.constant 0 : index
    %c0_16 = arith.constant 0 : index
    %33 = vector.load %arg6[%c0_15, %c0_16] : memref<1x32xf32, #tpu.memory_space<vmem>>, vector<1x32xf32>
    %c0_17 = arith.constant 0 : index
    %c0_18 = arith.constant 0 : index
    %34 = vector.load %arg7[%c0_17, %c0_18] : memref<1x32xf32, #tpu.memory_space<vmem>>, vector<1x32xf32>
    %c0_19 = arith.constant 0 : index
    %c0_20 = arith.constant 0 : index
    %35 = vector.load %arg8[%c0_19, %c0_20] : memref<32x32xbf16, #tpu.memory_space<vmem>>, vector<32x32xbf16>
    %c0_21 = arith.constant 0 : index
    %c0_22 = arith.constant 0 : index
    %36 = vector.load %arg9[%c0_21, %c0_22] : memref<1x32xf32, #tpu.memory_space<vmem>>, vector<1x32xf32>
    %cst_23 = arith.constant dense<0.000000e+00> : vector<16xf32>
    %37 = vector.multi_reduction <add>, %32, %cst_23 [1] : vector<16x32xf32> to vector<16xf32>
    %38 = vector.shape_cast %37 : vector<16xf32> to vector<16x1xf32>
    %cst_24 = arith.constant 3.200000e+01 : f32
    %39 = vector.broadcast %cst_24 : f32 to vector<16x1xf32>
    %40 = arith.divf %38, %39 : vector<16x1xf32>
    %41 = vector.broadcast %40 : vector<16x1xf32> to vector<16x32xf32>
    %42 = arith.subf %32, %41 : vector<16x32xf32>
    %43 = arith.mulf %42, %42 : vector<16x32xf32>
    %cst_25 = arith.constant dense<0.000000e+00> : vector<16xf32>
    %44 = vector.multi_reduction <add>, %43, %cst_25 [1] : vector<16x32xf32> to vector<16xf32>
    %45 = vector.shape_cast %44 : vector<16xf32> to vector<16x1xf32>
    %cst_26 = arith.constant 3.200000e+01 : f32
    %46 = vector.broadcast %cst_26 : f32 to vector<16x1xf32>
    %47 = arith.divf %45, %46 : vector<16x1xf32>
    %48 = vector.broadcast %40 : vector<16x1xf32> to vector<16x32xf32>
    %49 = arith.subf %32, %48 : vector<16x32xf32>
    %cst_27 = arith.constant 9.99999974E-6 : f32
    %50 = vector.broadcast %cst_27 : f32 to vector<16x1xf32>
    %51 = arith.addf %47, %50 : vector<16x1xf32>
    %52 = math.rsqrt %51 : vector<16x1xf32>
    %53 = vector.broadcast %52 : vector<16x1xf32> to vector<16x32xf32>
    %54 = arith.mulf %49, %53 : vector<16x32xf32>
    %55 = vector.broadcast %33 : vector<1x32xf32> to vector<16x32xf32>
    %56 = arith.mulf %54, %55 : vector<16x32xf32>
    %57 = vector.broadcast %34 : vector<1x32xf32> to vector<16x32xf32>
    %58 = arith.addf %56, %57 : vector<16x32xf32>
    %59 = arith.truncf %58 : vector<16x32xf32> to vector<16x32xbf16>
    %cst_28 = arith.constant dense<0.000000e+00> : vector<16x32xf32>
    %60 = tpu.matmul %59, %35, %cst_28 {dimension_numbers = #tpu.dot_dimension_numbers<[1], [0], [0], [1], [0, 0, 1, 1], [], []>} : vector<16x32xbf16>, vector<32x32xbf16>, vector<16x32xf32> -> vector<16x32xf32>
    %61 = vector.broadcast %36 : vector<1x32xf32> to vector<16x32xf32>
    %62 = arith.addf %60, %61 : vector<16x32xf32>
    %c0_29 = arith.constant 0 : index
    %c0_30 = arith.constant 0 : index
    %63 = vector.load %arg10[%c0_29, %c0_30] : memref<16x32xf32, #tpu.memory_space<vmem>>, vector<16x32xf32>
    tpu.vector_store %arg10[%c0_29, %c0_30], %62 {strides = array<i32>} : memref<16x32xf32, #tpu.memory_space<vmem>>, vector<16x32xf32>,
    return
  }
  func.func @transform_0(%arg0: i32) -> (i32, i32) {
    %c0_i32 = arith.constant 0 : i32
    %c0_i32_0 = arith.constant 0 : i32
    return %arg0, %c0_i32 : i32, i32
  }
  func.func @transform_1(%arg0: i32) -> (i32, i32) {
    %c0_i32 = arith.constant 0 : i32
    %c0_i32_0 = arith.constant 0 : i32
    %c0_i32_1 = arith.constant 0 : i32
    return %c0_i32, %c0_i32_0 : i32, i32
  }
  func.func @transform_2(%arg0: i32) -> (i32, i32) {
    %c0_i32 = arith.constant 0 : i32
    %c0_i32_0 = arith.constant 0 : i32
    %c0_i32_1 = arith.constant 0 : i32
    return %c0_i32, %c0_i32_0 : i32, i32
  }
  func.func @transform_3(%arg0: i32) -> (i32, i32) {
    %c0_i32 = arith.constant 0 : i32
    %c0_i32_0 = arith.constant 0 : i32
    %c0_i32_1 = arith.constant 0 : i32
    return %c0_i32, %c0_i32_0 : i32, i32
  }
  func.func @transform_4(%arg0: i32) -> (i32, i32) {
    %c0_i32 = arith.constant 0 : i32
    %c0_i32_0 = arith.constant 0 : i32
    %c0_i32_1 = arith.constant 0 : i32
    return %c0_i32, %c0_i32_0 : i32, i32
  }
  func.func @transform_5(%arg0: i32) -> (i32, i32) {
    %c0_i32 = arith.constant 0 : i32
    %c0_i32_0 = arith.constant 0 : i32
    %c0_i32_1 = arith.constant 0 : i32
    return %c0_i32, %c0_i32_0 : i32, i32
  }
  func.func @transform_6(%arg0: i32) -> (i32, i32) {
    %c0_i32 = arith.constant 0 : i32
    %c0_i32_0 = arith.constant 0 : i32
    %c0_i32_1 = arith.constant 0 : i32
    return %c0_i32, %c0_i32_0 : i32, i32
  }
  func.func @transform_7(%arg0: i32) -> (i32, i32) {
    %c0_i32 = arith.constant 0 : i32
    %c0_i32_0 = arith.constant 0 : i32
    %c0_i32_1 = arith.constant 0 : i32
    return %c0_i32, %c0_i32_0 : i32, i32
  }
  func.func @transform_8(%arg0: i32) -> (i32, i32) {
    %c0_i32 = arith.constant 0 : i32
    %c0_i32_0 = arith.constant 0 : i32
    %c0_i32_1 = arith.constant 0 : i32
    return %c0_i32, %c0_i32_0 : i32, i32
  }
  func.func @transform_9(%arg0: i32) -> (i32, i32) {
    %c0_i32 = arith.constant 0 : i32
    %c0_i32_0 = arith.constant 0 : i32
    return %arg0, %c0_i32 : i32, i32
  }
}

</mosaic_0001>

<bundles_post_ra>
// kernel: tpu_custom_call.1
= control target key start
LH: loop header
LB: loop body
LE: loop exit
PB: predicated region body
PF: predicated region fallthrough
CT: control target
= control target key end

     0   :  { %14 = vsyncpa [#allocation3], 0  ;;  %s1007_s0 = inlined_call_operand.vmem [shape: f32[32,24], index: 0, kind: input, shape index: {}]   ;;  %s1008_s1 = inlined_call_operand.vmem [shape: f32[1,24], index: 1, kind: input, shape index: {}]   ;;  %s1009_s2 = inlined_call_operand.vmem [shape: f32[1,24], index: 2, kind: input, shape index: {}]   ;;  %s1010_s3 = inlined_call_operand.vmem [shape: bf16[24,32], index: 3, kind: input, shape index: {}]   ;;  %s1011_s4 = inlined_call_operand.vmem [shape: f32[1,32], index: 4, kind: input, shape index: {}]   ;;  %s1012_s5 = inlined_call_operand.vmem [shape: f32[1,32], index: 5, kind: input, shape index: {}]   ;;  %s1013_s6 = inlined_call_operand.vmem [shape: f32[1,32], index: 6, kind: input, shape index: {}]   ;;  %s1014_s7 = inlined_call_operand.vmem [shape: bf16[32,32], index: 7, kind: input, shape index: {}]   ;;  %s1015_s8 = inlined_call_operand.vmem [shape: f32[1,32], index: 8, kind: input, shape index: {}]   ;;  %s1016_s9 = inlined_call_operand.hbm [shape: f32[32,32], index: 9, kind: output, shape index: {}]  }
   0x1   :  { %16 = vsyncpa [#allocation3 + $0x1], 0  ;;  %s864_s30 = smov 0   ;;  %s866_s10 = smov 0  }
   0x2   :  { %s868_s11 = smov 0   ;;  %s870_s12 = smov 0  }
   0x3 LB: > { %s885_s13 = sadd.s32 4294967295, %s807_s12   ;;  %s645_s14 = sadd.s32 4294967294, %s807_s12   ;;  %s807_s12 = sphi %s870_s12, %s1022_s12   ;;  %s803_s11 = sphi %s868_s11, %s1021_s11   ;;  %s799_s10 = sphi %s866_s10, %s1020_s10   ;;  %s795_s30 = sphi %s864_s30, %s1019_s30  }
   0x4   : > { %s889_s15 = sadd.s32 1, %s807_s12   ;;  %s223_s16 = sadd.s32 1, %s803_s11 }
   0x5   : > { %s220_s17 = ssub.s32 %s807_s12, %s889_s15  ;;  %p233_p0 = scmp.ne.s32.totalorder %s803_s11, %s799_s10 }
   0x6   : > { %p221_p1 = scmp.eq.s32.totalorder %s220_s17, 0  ;;  %p234_p2 = scmp.eq.s32.totalorder %s885_s13, 1 }
   0x7   : > { %p239_p3 = scmp.ne.s32.totalorder %s799_s10, %s795_s30  ;;  %p240_p4 = scmp.eq.s32.totalorder %s645_s14, 1 }
   0x8   : > { %s900_s18 = scalar_select %p221_p1, %s803_s11, %s223_s16  }
   0x9   : > { %p902_p5 = por %p234_p2, %p233_p0  ;;  %p906_p6 = por %p240_p4, %p239_p3 }
   0xa   : > { %p648_p7 = scmp.ge.s32.totalorder %s807_s12, 1  ;;  %p291_p8 = scmp.lt.s32.totalorder %s807_s12, 3 }
   0xc   : > { %p292_p9 = pnand %p648_p7, %p291_p8 }
   0xd   : > { %s650_s21 = sshll.u32 (!%p292_p9), %s885_s13, 1  ;;  %s324_s17 = sand.u32 (!%p292_p9), 1, %s799_s10  }
   0xe   : > { %295 = sbr.rel (%p292_p9) target bundleno = 1061 (0x425), region = 56  ;;  %p328_p10 = scmp.lt.s32.totalorder (!%p292_p9), %s650_s21, 3 }
   0xf   : > { %s669_s26 = sshll.u32 (!%p292_p9), %s885_s13, 8  ;;  %s967_s14 = scalar_lea.sflag (!%p292_p9), [#allocation3], %s324_s17 }
  0x10   : > { %s964_s29 = scalar_lea.hbm (!%p292_p9), %s1016_s9, %s669_s26  ;;  %s811_s16 = smov (!%p292_p9), [#allocation2]  }
  0x13   : > { %s1024_s21 = smov (!%p328_p10, %s650_s21), 3  ;;  %vm343_vm0 = vcmask 195584   ;;  %v735_v14 = vld [vmem:[%s1010_s3 + $0x8] ss:$0 sps:$4 sm:$0xff]   ;;  %vm406_vm1 = vcmask 1043456   ;;  %v809_v15 = vmov 0.0  }
  0x14   : > { %s651_s22 = sshll.u32 %s1024_s21, 3  ;;  %676 = vmatprep.subr.bf16.mxu0 %v809_v15  ;;  %vm810_vm2 = vmmov 0   ;;  %v408_v16 = vsel %vm406_vm1, %v735_v14, 0  ;;  %684 = vmatprep.subr.bf16.mxu1 %v809_v15  ;;  %v736_v17 = vld [vmem:[%s1010_s3] sm:$0xff]   ;;  %vm460_vm3 = vcmask 261120   ;;  %v737_v56 = vld [vmem:[%s1014_s7 + $0x8] sm:$0xff]  }
  0x15   : > { %s331_s25 = scalar_lea.vmem %s1007_s0, %s651_s22  ;;  %680 = vmatprep.mubr.msk.bf16.mxu0 %vm810_vm2, %v809_v15  ;;  %688 = vmatprep.mubr.msk.bf16.mxu1 %vm810_vm2, %v809_v15  ;;  %v652_v26 = vld [vmem:[%s1008_s1] ss:$0 sm:$0xff]  ;;  %s649_s21 = sshll.u32 %s324_s17, 4 }
  0x16   : > { %v335_v0 = vld [vmem:[%s331_s25] sm:$0xff]  ;;  %v336_v1 = vld [vmem:[%s331_s25 + $0x8] sm:$0xff]  ;;  %677 = vmatpush3.bf16.msra.mxu0 %v408_v16  ;;  %685 = vmatpush3.bf16.msra.mxu1 %v737_v56  ;;  %s326_s24 = scalar_lea.vmem [#allocation2], %s649_s21  ;;  %s751_s21 = sshll.u32 %s811_s16, 4  ;;  %s752_s21 = int_to_ptr.vmem [resolvable:$false] %s751_s21 }
  0x17   : > { %v344_v2 = vsel %vm343_vm0, %v335_v0, 0.0  ;;  %v347_v3 = vsel %vm343_vm0, %v336_v1, 0.0  ;;  %678 = vmatprep.subr.bf16.mxu0 %v809_v15  ;;  %v653_v30 = vld [vmem:[%s1009_s2] ss:$0 sm:$0xff]  ;;  %686 = vmatprep.subr.bf16.mxu1 %v809_v15  ;;  %s583_s25 = sshll.u32 %s326_s24, 4  ;;  %s753_s22 = scalar_lea.vmem %s752_s21, 512  ;;  %s959_s25 = int_to_ptr.vmem [resolvable:$true] %s583_s25 }
  0x18   : > { %345 = vadd.xlane.f32.xlu0 %v344_v2  ;;  %v654_v35 = vld [vmem:[%s1011_s4] ss:$0 sm:$0xff]  ;;  %s747_s13 = scalar_lea.vmem %s959_s25, 256  ;;  %p754_p0 = scmp.lt.s32.totalorder %s959_s25, %s752_s21 }
  0x19   : > { %v738_v57 = vld [vmem:[%s1014_s7] sm:$0xff]   ;;  %p748_p11 = scmp.ne.s32.totalorder %s959_s25, %s747_s13  ;;  %p755_p1 = scmp.lt.s32.totalorder %s753_s22, %s747_s13 }
  0x1a   : > { %679 = vmatpush3.bf16.msra.mxu0 %v736_v17  ;;  %687 = vmatpush3.bf16.msra.mxu1 %v738_v57  ;;  %v658_v2 = vld [vmem:[%s1012_s5] ss:$0 sm:$0xff] }
  0x1b   : > { %p749_p12 = pnand %p748_p11, %p902_p5  ;;  %p756_p2 = por %p755_p1, %p754_p0 }
  0x1c   : > { %348 = vadd.xlane.f32.xlu0 %v347_v3 }
  0x1d   : > { %p750_p13 = pneg %p749_p12 }
  0x1f   : > { %p757_p3 = pnand %p756_p2, %p750_p13 }
  0xa1   : > { %v346_v4 = vpop.xlane.xlu0 %345 }
  0xa2   : > { %v351_v5 = vmul.f32 0.041666668, %v346_v4 }
  0xa4   : > { %v353_v6 = vsub.f32 %v335_v0, %v351_v5 }
  0xa5   : > { %v349_v7 = vpop.xlane.xlu0 %348 }
  0xa6   : > { %v352_v8 = vmul.f32 0.041666668, %v349_v7  ;;  %v355_v9 = vmul.f32 %v353_v6, %v353_v6 }
  0xa8   : > { %v354_v10 = vsub.f32 %v336_v1, %v352_v8  ;;  %v357_v11 = vsel %vm343_vm0, %v355_v9, 0.0 }
  0xa9   : > { %358 = vadd.xlane.f32.xlu1 %v357_v11  ;;  %v660_v11 = vld [vmem:[%s1015_s8] ss:$0 sm:$0xff] }
  0xaa   : > { %v356_v12 = vmul.f32 %v354_v10, %v354_v10 }
  0xac   : > { %v360_v13 = vsel %vm343_vm0, %v356_v12, 0.0 }
  0xad   : > { %361 = vadd.xlane.f32.xlu1 %v360_v13 }
 0x132   : > { %v359_v18 = vpop.xlane.xlu1 %358 }
 0x133   : > { %v363_v19 = vmul.f32 0.041666668, %v359_v18 }
 0x135   : > { %v365_v20 = vadd.f32 1e-05, %v363_v19 }
 0x136   : > { %v362_v21 = vpop.xlane.xlu1 %361 }
 0x137   : > { %739 = vrsqrt.f32 %v365_v20  ;;  %v364_v22 = vmul.f32 0.041666668, %v362_v21 }
 0x139   : > { %v366_v23 = vadd.f32 1e-05, %v364_v22 }
 0x13b   : > { %741 = vrsqrt.f32 %v366_v23 }
 0x144   : > { %v740_v24 = vpop.eup %739 }
 0x145   : > { %v369_v25 = vmul.f32 %v740_v24, %v353_v6  ;;  %v659_v6 = vld [vmem:[%s1013_s6] ss:$0 sm:$0xff] }
 0x147   : > { %v377_v29 = vmul.f32 %v652_v26, %v369_v25 }
 0x148   : > { %v742_v27 = vpop.eup %741 }
 0x149   : > { %v370_v28 = vmul.f32 %v742_v27, %v354_v10  ;;  %v385_v32 = vadd.f32 %v653_v30, %v377_v29 }
 0x14b   : > { %v378_v31 = vmul.f32 %v652_v26, %v370_v28 }
 0x14d   : > { %v386_v33 = vadd.f32 %v653_v30, %v378_v31 }
 0x14f   : > { %v387_v34 = vpack.c.bf16 %v386_v33, %v385_v32 }
 0x151   : > { %681 = vmatmul.mubr.msk.bf16.vlgmr.msra.gmra.mxu0 %vm343_vm0, %v387_v34 }
 0x211   : > { %v444_v36 = vpop.f32.mrf.mxu0 }
 0x212   : > { %v445_v37 = vadd.f32 %v654_v35, %v444_v36 }
 0x213   : > { %v682_v38 = vpop.f32.mrf.mxu0 }
 0x214   : > { %v451_v39 = vmax.f32 %v445_v37, 0.0 }
 0x215   : > { %v447_v40 = vpop.f32.mrf.mxu0 }
 0x216   : > { %v448_v41 = vadd.f32 %v654_v35, %v447_v40  ;;  %v461_v42 = vsel %vm460_vm3, %v451_v39, 0.0 }
 0x217   : > { %462 = vadd.xlane.f32.xlu0 %v461_v42  ;;  %v683_v43 = vpop.f32.mrf.mxu0 }
 0x218   : > { %v452_v44 = vmax.f32 %v448_v41, 0.0 }
 0x21a   : > { %v464_v45 = vsel %vm460_vm3, %v452_v44, 0.0 }
 0x21b   : > { %465 = vadd.xlane.f32.xlu1 %v464_v45 }
 0x2a0   : > { %v463_v46 = vpop.xlane.xlu0 %462 }
 0x2a1   : > { %v468_v47 = vmul.f32 0.03125, %v463_v46 }
 0x2a3   : > { %v470_v48 = vsub.f32 %v451_v39, %v468_v47 }
 0x2a4   : > { %v466_v49 = vpop.xlane.xlu1 %465 }
 0x2a5   : > { %v469_v50 = vmul.f32 0.03125, %v466_v49  ;;  %v472_v51 = vmul.f32 %v470_v48, %v470_v48 }
 0x2a7   : > { %v471_v52 = vsub.f32 %v452_v44, %v469_v50  ;;  %v474_v53 = vsel %vm460_vm3, %v472_v51, 0.0 }
 0x2a8   : > { %475 = vadd.xlane.f32.xlu0 %v474_v53 }
 0x2a9   : > { %v473_v54 = vmul.f32 %v471_v52, %v471_v52 }
 0x2ab   : > { %v477_v55 = vsel %vm460_vm3, %v473_v54, 0.0 }
 0x2ac   : > { %478 = vadd.xlane.f32.xlu1 %v477_v55 }
 0x331   : > { %v476_v58 = vpop.xlane.xlu0 %475 }
 0x332   : > { %v480_v59 = vmul.f32 0.03125, %v476_v58 }
 0x334   : > { %v482_v60 = vadd.f32 1e-05, %v480_v59 }
 0x335   : > { %v479_v61 = vpop.xlane.xlu1 %478 }
 0x336   : > { %743 = vrsqrt.f32 %v482_v60  ;;  %v481_v62 = vmul.f32 0.03125, %v479_v61 }
 0x338   : > { %v483_v63 = vadd.f32 1e-05, %v481_v62 }
 0x33a   : > { %745 = vrsqrt.f32 %v483_v63 }
 0x343   : > { %v744_v0 = vpop.eup %743 }
 0x344   : > { %v486_v1 = vmul.f32 %v744_v0, %v470_v48 }
 0x346   : > { %v494_v5 = vmul.f32 %v658_v2, %v486_v1 }
 0x347   : > { %v746_v3 = vpop.eup %745 }
 0x348   : > { %v487_v4 = vmul.f32 %v746_v3, %v471_v52  ;;  %v502_v8 = vadd.f32 %v659_v6, %v494_v5 }
 0x34a   : > { %v495_v7 = vmul.f32 %v658_v2, %v487_v4 }
 0x34c   : > { %v503_v9 = vadd.f32 %v659_v6, %v495_v7 }
 0x34e   : > { %v504_v10 = vpack.c.bf16 %v503_v9, %v502_v8 }
 0x350   : > { %689 = vmatmul.mubr.msk.bf16.vlgmr.msra.gmra.mxu1 %vm460_vm3, %v504_v10 }
 0x410   : > { %v560_v12 = vpop.f32.mrf.mxu1 }
 0x411   : > { %v561_v13 = vadd.f32 %v660_v11, %v560_v12 }
 0x412   : > { %v690_v14 = vpop.f32.mrf.mxu1 }
 0x413   : > { %567 = vst.msk [vmem:[%s326_s24] sm:$0xff] %vm460_vm3, %v561_v13 }
 0x414   : > { %v563_v15 = vpop.f32.mrf.mxu1 }
 0x415   : > { %v564_v16 = vadd.f32 %v660_v11, %v563_v15 }
 0x416   : > { %v691_v17 = vpop.f32.mrf.mxu1 }
 0x417   : > { %568 = vst.msk [vmem:[%s326_s24 + $0x8] sm:$0xff] %vm460_vm3, %v564_v16 }
 0x418   : > { %760 = shalt.err (!%p757_p3)
}
 0x419   : > { %s761_s17 = scalar_lea.hbm %s964_s29, 256  ;;  %s765_s26 = scalar_lea.hbm %s1016_s9, 512 }
 0x41a   : > { %p762_p4 = scmp.ne.s32.totalorder %s964_s29, %s761_s17  ;;  %p766_p9 = scmp.lt.s32.totalorder %s964_s29, %s1016_s9 }
 0x41b   : > { %p767_p10 = scmp.lt.s32.totalorder %s765_s26, %s761_s17 }
 0x41c   : > { %p763_p7 = pnand %p762_p4, %p902_p5 }
 0x41d   : > { %p768_p11 = por %p767_p10, %p766_p9 }
 0x41e   : > { %p764_p8 = pneg %p763_p7 }
 0x420   : > { %p769_p12 = pnand %p768_p11, %p764_p8 }
 0x422   : > { %772 = shalt.err (!%p769_p12)
}
 0x423   : > { %s812_s13 = smov 128   ;;  %s813_s16 = smov 8  }
 0x424   : > { %692 = dma.vmem_to_hbm [thread:$0]  (%p902_p5), %s959_s25, 256, %s964_s29, %s967_s14, %s812_s13, %s812_s13, %s813_s16  }
 0x425 PF: > { %p698_p13 = scmp.ge.s32.totalorder %s807_s12, 2  ;;  %s598_s21 = sand.u32 1, %s795_s30  }
 0x426   : > { %s599_s22 = scalar_lea.sflag [#allocation3], %s598_s21 }
 0x427   : > { %p695_p0 = pnand %p698_p13, %p906_p6 }
 0x429   : > { %p696_p1 = pneg %p695_p0 }
 0x42b   : > { %790 = dma.done.wait (%p696_p1), %s599_s22, 256  }
 0x42c   : > { %792 = vsyncadd (%p696_p1), %s599_s22, 4294967040  ;;  %p19_p2 = scmp.ge.s32.totalorder %s889_s15, 4   ;;  %s1019_s30 = smov %s799_s10 }
 0x42d   : > { %s1020_s10 = smov %s803_s11  ;;  %s1021_s11 = smov %s900_s18 }
 0x42e   : > { %s1022_s12 = smov %s889_s15  ;;  %21 = sbr.rel (!%p19_p2) target bundleno = 3 (0x3), region = 91 }
 0x433   :  { %604 = vsyncpa [#allocation3], 1 }
 0x434   :  { %606 = vsyncpa [#allocation3 + $0x1], 1 }

</bundles_post_ra>
